<compile_context>
chip_gen: v5e
topology: v5e:2x2
jax: 0.10.0
libtpu: 0.0.40
codegen_flags: <defaults>
</compile_context>

<pallas_src>
import functools

import jax
import jax.numpy as jnp
import numpy as np
from jax.experimental import pallas as pl
from jax.experimental.pallas import tpu as pltpu

LANE = 128   # pad feature dims to multiples of this (lane-dense vregs / vst)
TM = 128     # dst-row tile


def fused_sage_kernel(adj_ref, dinv_ref, x_ref,
                      ws1_ref, wn1_ref, b1_ref,
                      ws2_ref, wn2_ref, b2_ref,
                      out_ref,
                      z_ref, h1_ref,
                      *, tm):
    # adj_ref : (tm, Np)  bf16, binary {0,1} adjacency row tile (dst rows, all src)
    # dinv_ref: (Np, 1)   f32, 1 / max(in_degree, 1)          (resident)
    # x_ref   : (Np, Fp)  bf16, all node features             (resident)
    # ws*/wn* : (Fp|Hp, Hp) bf16 weights, b*: (1, Hp) f32     (resident)
    # out_ref : (tm, Hp)  f32 final-layer output tile
    # z_ref   : (Np, Hp)  bf16 VMEM scratch, Z = feats @ W_neigh (per phase)
    # h1_ref  : (Np, Hp)  bf16 VMEM scratch, layer-1 activations
    phase = pl.program_id(0)
    i = pl.program_id(1)
    row0 = pl.multiple_of(i * tm, tm)

    @pl.when(phase == 0)
    def _layer1():
        @pl.when(i == 0)
        def _():
            # One-time neighbor projection for layer 1: Z1 = X @ W_neigh1.
            z_ref[...] = jnp.dot(
                x_ref[...], wn1_ref[...],
                preferred_element_type=jnp.float32).astype(z_ref.dtype)

        agg = jnp.dot(adj_ref[...], z_ref[...],
                      preferred_element_type=jnp.float32)          # (tm, Hp)
        agg = agg * dinv_ref[pl.ds(row0, tm), :]                   # f32 mean scale
        self_p = jnp.dot(x_ref[pl.ds(row0, tm), :], ws1_ref[...],
                         preferred_element_type=jnp.float32)       # (tm, Hp)
        h1 = jnp.maximum(agg + self_p + b1_ref[...], 0.0)          # ReLU
        h1_ref[pl.ds(row0, tm), :] = h1.astype(h1_ref.dtype)
        # Keep the (revisited) output block defined during phase 0.
        out_ref[...] = jnp.zeros_like(out_ref)

    @pl.when(phase == 1)
    def _layer2():
        @pl.when(i == 0)
        def _():
            # One-time neighbor projection for layer 2: Z2 = H1 @ W_neigh2.
            z_ref[...] = jnp.dot(
                h1_ref[...], wn2_ref[...],
                preferred_element_type=jnp.float32).astype(z_ref.dtype)

        agg = jnp.dot(adj_ref[...], z_ref[...],
                      preferred_element_type=jnp.float32)
        agg = agg * dinv_ref[pl.ds(row0, tm), :]
        self_p = jnp.dot(h1_ref[pl.ds(row0, tm), :], ws2_ref[...],
                         preferred_element_type=jnp.float32)
        out_ref[...] = (agg + self_p + b2_ref[...]).astype(out_ref.dtype)


def prepare_graph(adj_bin, *, tm=TM):
    """One-time: pad + cast the binary adjacency, compute f32 1/in-degree."""
    n = adj_bin.shape[0]
    np_ = pl.cdiv(n, tm) * tm
    deg = jnp.sum(adj_bin, axis=1, keepdims=True)                  # in-degree per dst
    dinv = 1.0 / jnp.maximum(deg, 1.0)
    adj_p = jnp.pad(adj_bin, ((0, np_ - n), (0, np_ - n))).astype(jnp.bfloat16)
    dinv_p = jnp.pad(dinv, ((0, np_ - n), (0, 0))).astype(jnp.float32)
    return adj_p, dinv_p


def prepare_params(params, in_feats, h_feats):
    """One-time: lane-pad weights/biases, cast weights to bf16 for the MXU."""
    fp = pl.cdiv(in_feats, LANE) * LANE
    hp = pl.cdiv(h_feats, LANE) * LANE

    def padw(w, k):
        return jnp.pad(w, ((0, k - w.shape[0]), (0, hp - w.shape[1]))).astype(jnp.bfloat16)

    def padb(b):
        return jnp.pad(b, ((0, 0), (0, hp - b.shape[1]))).astype(jnp.float32)

    return {
        "ws1": padw(params["w_self1"], fp), "wn1": padw(params["w_neigh1"], fp),
        "b1": padb(params["b1"]),
        "ws2": padw(params["w_self2"], hp), "wn2": padw(params["w_neigh2"], hp),
        "b2": padb(params["b2"]),
    }


@functools.partial(jax.jit, static_argnames=("n", "h_feats", "tm"))
def graphsage_forward(adj_p, dinv_p, x, pp, *, n, h_feats, tm=TM):
    """Fused two-layer GraphSAGE forward (single pallas_call)."""
    np_ = adj_p.shape[0]
    in_feats = x.shape[1]
    fp = pp["ws1"].shape[0]
    hp = pp["ws1"].shape[1]
    assert np_ % tm == 0
    r = np_ // tm

    x_p = jnp.pad(x, ((0, np_ - n), (0, fp - in_feats))).astype(jnp.bfloat16)

    kernel = functools.partial(fused_sage_kernel, tm=tm)
    out_p = pl.pallas_call(
        kernel,
        out_shape=jax.ShapeDtypeStruct((np_, hp), jnp.float32),
        grid=(2, r),                                   # (layer phase, dst-row tile)
        in_specs=[
            pl.BlockSpec((tm, np_), lambda p, i: (i, 0)),   # adj row tile (streamed)
            pl.BlockSpec((np_, 1), lambda p, i: (0, 0)),    # 1/in-degree (resident)
            pl.BlockSpec((np_, fp), lambda p, i: (0, 0)),   # features     (resident)
            pl.BlockSpec((fp, hp), lambda p, i: (0, 0)),    # W_self1
            pl.BlockSpec((fp, hp), lambda p, i: (0, 0)),    # W_neigh1
            pl.BlockSpec((1, hp), lambda p, i: (0, 0)),     # b1
            pl.BlockSpec((hp, hp), lambda p, i: (0, 0)),    # W_self2
            pl.BlockSpec((hp, hp), lambda p, i: (0, 0)),    # W_neigh2
            pl.BlockSpec((1, hp), lambda p, i: (0, 0)),     # b2
        ],
        out_specs=pl.BlockSpec((tm, hp), lambda p, i: (i, 0)),
        scratch_shapes=[
            pltpu.VMEM((np_, hp), jnp.bfloat16),   # Z = feats @ W_neigh (per phase)
            pltpu.VMEM((np_, hp), jnp.bfloat16),   # h1 (layer-1 activations)
        ],
        compiler_params=pltpu.CompilerParams(
            dimension_semantics=("arbitrary", "arbitrary"),  # phase & rows sequential
            vmem_limit_bytes=32 * 1024 * 1024,
        ),
    )(adj_p, dinv_p, x_p, pp["ws1"], pp["wn1"], pp["b1"],
      pp["ws2"], pp["wn2"], pp["b2"])

    return out_p[:n, :h_feats]


def reference_forward(adj_norm, x, params):
    """Pure-JAX f32 reference for correctness checking."""
    agg1 = adj_norm @ x
    h1 = jax.nn.relu(x @ params["w_self1"] + agg1 @ params["w_neigh1"] + params["b1"])
    agg2 = adj_norm @ h1
    return h1 @ params["w_self2"] + agg2 @ params["w_neigh2"] + params["b2"]


if __name__ == "__main__":
    N = 64          # number of graph nodes
    in_feats = 32
    h_feats = 32

    key = jax.random.PRNGKey(0)
    k_adj, k_x, k1, k2, k3, k4 = jax.random.split(key, 6)

    # Deterministic synthetic graph: random directed adjacency, clipped at 0
    # (mirrors `adj_mat = np.maximum(adj_mat, 0)` + dgl.graph(nonzero(...))).
    adj_raw = jax.random.uniform(k_adj, (N, N)) - 0.7
    adj_bin = jnp.maximum(jnp.sign(adj_raw), 0.0)              # {0,1}, edge j->i at adj[i, j]

    # Deterministic node features and parameters (SAGEConv: fc_self, fc_neigh, bias).
    x = jax.random.normal(k_x, (N, in_feats), dtype=jnp.float32)
    scale1 = 1.0 / np.sqrt(in_feats)
    scale2 = 1.0 / np.sqrt(h_feats)
    params = {
        "w_self1":  scale1 * jax.random.normal(k1, (in_feats, h_feats), dtype=jnp.float32),
        "w_neigh1": scale1 * jax.random.normal(k2, (in_feats, h_feats), dtype=jnp.float32),
        "b1":       jnp.zeros((1, h_feats), dtype=jnp.float32),
        "w_self2":  scale2 * jax.random.normal(k3, (h_feats, h_feats), dtype=jnp.float32),
        "w_neigh2": scale2 * jax.random.normal(k4, (h_feats, h_feats), dtype=jnp.float32),
        "b2":       jnp.zeros((1, h_feats), dtype=jnp.float32),
    }

    # One-time graph / parameter preparation (hoisted out of the forward path).
    adj_p, dinv_p = prepare_graph(adj_bin, tm=TM)
    pp = prepare_params(params, in_feats, h_feats)

    out = graphsage_forward(adj_p, dinv_p, x, pp, n=N, h_feats=h_feats, tm=TM)
    out = jax.block_until_ready(out)

    # Reference uses the row-normalized f32 adjacency (exact 'mean' aggregator).
    in_deg = jnp.sum(adj_bin, axis=1, keepdims=True)
    adj_norm = (adj_bin / jnp.maximum(in_deg, 1.0)).astype(jnp.float32)
    ref = reference_forward(adj_norm, x, params)

    # bf16 MXU inputs (f32 accumulation) -> relaxed tolerance vs. f32 reference.
    np.testing.assert_allclose(np.asarray(out), np.asarray(ref), rtol=2e-2, atol=2e-2)

    print("KERNEL_OK")
</pallas_src>

<mosaic_0001>
module attributes {stable_mosaic.version = 11 : i64} {
  func.func @fused_sage_kernel(%arg0: i32, %arg1: i32, %arg2: memref<128x128xbf16, #tpu.memory_space<vmem>>, %arg3: memref<128x1xf32, #tpu.memory_space<vmem>>, %arg4: memref<128x128xbf16, #tpu.memory_space<vmem>>, %arg5: memref<128x128xbf16, #tpu.memory_space<vmem>>, %arg6: memref<128x128xbf16, #tpu.memory_space<vmem>>, %arg7: memref<1x128xf32, #tpu.memory_space<vmem>>, %arg8: memref<128x128xbf16, #tpu.memory_space<vmem>>, %arg9: memref<128x128xbf16, #tpu.memory_space<vmem>>, %arg10: memref<1x128xf32, #tpu.memory_space<vmem>>, %arg11: memref<128x128xf32, #tpu.memory_space<vmem>>, %arg12: memref<128x128xbf16, #tpu.memory_space<vmem>>, %arg13: memref<128x128xbf16, #tpu.memory_space<vmem>>) attributes {dimension_semantics = [#tpu.dimension_semantics<arbitrary>, #tpu.dimension_semantics<arbitrary>], iteration_bounds = array<i64: 2, 1>, scalar_prefetch = 0 : i64, scratch_operands = 2 : i64, tpu.core_type = #tpu.core_type<tc>, window_params = [{transform_indices = @transform_0, window_bounds = array<i64: 128, 128>}, {pipeline_mode = #tpu.pipeline_mode<synchronous>, transform_indices = @transform_1, window_bounds = array<i64: 128, 1>}, {pipeline_mode = #tpu.pipeline_mode<synchronous>, transform_indices = @transform_2, window_bounds = array<i64: 128, 128>}, {pipeline_mode = #tpu.pipeline_mode<synchronous>, transform_indices = @transform_3, window_bounds = array<i64: 128, 128>}, {pipeline_mode = #tpu.pipeline_mode<synchronous>, transform_indices = @transform_4, window_bounds = array<i64: 128, 128>}, {pipeline_mode = #tpu.pipeline_mode<synchronous>, transform_indices = @transform_5, window_bounds = array<i64: 1, 128>}, {pipeline_mode = #tpu.pipeline_mode<synchronous>, transform_indices = @transform_6, window_bounds = array<i64: 128, 128>}, {pipeline_mode = #tpu.pipeline_mode<synchronous>, transform_indices = @transform_7, window_bounds = array<i64: 128, 128>}, {pipeline_mode = #tpu.pipeline_mode<synchronous>, transform_indices = @transform_8, window_bounds = array<i64: 1, 128>}, {transform_indices = @transform_9, window_bounds = array<i64: 128, 128>}]} {
    %c128_i32 = arith.constant 128 : i32
    %0 = arith.muli %arg1, %c128_i32 : i32
    %1 = tpu.assume_multiple %0, 128 : i32
    %c0_i32 = arith.constant 0 : i32
    %2 = arith.cmpi eq, %arg0, %c0_i32 : i32
    %3 = arith.extui %2 : i1 to i32
    %c0_i32_0 = arith.constant 0 : i32
    %4 = arith.cmpi ne, %3, %c0_i32_0 : i32
    scf.if %4 {
      %c0_i32_2 = arith.constant 0 : i32
      %8 = arith.cmpi eq, %arg1, %c0_i32_2 : i32
      %9 = arith.extui %8 : i1 to i32
      %c0_i32_3 = arith.constant 0 : i32
      %10 = arith.cmpi ne, %9, %c0_i32_3 : i32
      scf.if %10 {
        %c0_19 = arith.constant 0 : index
        %c0_20 = arith.constant 0 : index
        %33 = vector.load %arg4[%c0_19, %c0_20] : memref<128x128xbf16, #tpu.memory_space<vmem>>, vector<128x128xbf16>
        %c0_21 = arith.constant 0 : index
        %c0_22 = arith.constant 0 : index
        %34 = vector.load %arg6[%c0_21, %c0_22] : memref<128x128xbf16, #tpu.memory_space<vmem>>, vector<128x128xbf16>
        %cst_23 = arith.constant dense<0.000000e+00> : vector<128x128xf32>
        %35 = tpu.matmul %33, %34, %cst_23 {dimension_numbers = #tpu.dot_dimension_numbers<[1], [0], [0], [1], [0, 0, 1, 1], [], []>} : vector<128x128xbf16>, vector<128x128xbf16>, vector<128x128xf32> -> vector<128x128xf32>
        %36 = arith.truncf %35 : vector<128x128xf32> to vector<128x128xbf16>
        %c0_24 = arith.constant 0 : index
        %c0_25 = arith.constant 0 : index
        %37 = vector.load %arg12[%c0_24, %c0_25] : memref<128x128xbf16, #tpu.memory_space<vmem>>, vector<128x128xbf16>
        tpu.vector_store %arg12[%c0_24, %c0_25], %36 {strides = array<i32>} : memref<128x128xbf16, #tpu.memory_space<vmem>>, vector<128x128xbf16>,
      } else {
      }
      %c0 = arith.constant 0 : index
      %c0_4 = arith.constant 0 : index
      %11 = vector.load %arg2[%c0, %c0_4] : memref<128x128xbf16, #tpu.memory_space<vmem>>, vector<128x128xbf16>
      %c0_5 = arith.constant 0 : index
      %c0_6 = arith.constant 0 : index
      %12 = vector.load %arg12[%c0_5, %c0_6] : memref<128x128xbf16, #tpu.memory_space<vmem>>, vector<128x128xbf16>
      %cst = arith.constant dense<0.000000e+00> : vector<128x128xf32>
      %13 = tpu.matmul %11, %12, %cst {dimension_numbers = #tpu.dot_dimension_numbers<[1], [0], [0], [1], [0, 0, 1, 1], [], []>} : vector<128x128xbf16>, vector<128x128xbf16>, vector<128x128xf32> -> vector<128x128xf32>
      %14 = arith.index_cast %1 : i32 to index
      %c0_7 = arith.constant 0 : index
      %15 = vector.load %arg3[%14, %c0_7] : memref<128x1xf32, #tpu.memory_space<vmem>>, vector<128x1xf32>
      %16 = vector.broadcast %15 : vector<128x1xf32> to vector<128x128xf32>
      %17 = arith.mulf %13, %16 : vector<128x128xf32>
      %18 = arith.index_cast %1 : i32 to index
      %c0_8 = arith.constant 0 : index
      %19 = vector.load %arg4[%18, %c0_8] : memref<128x128xbf16, #tpu.memory_space<vmem>>, vector<128x128xbf16>
      %c0_9 = arith.constant 0 : index
      %c0_10 = arith.constant 0 : index
      %20 = vector.load %arg5[%c0_9, %c0_10] : memref<128x128xbf16, #tpu.memory_space<vmem>>, vector<128x128xbf16>
      %cst_11 = arith.constant dense<0.000000e+00> : vector<128x128xf32>
      %21 = tpu.matmul %19, %20, %cst_11 {dimension_numbers = #tpu.dot_dimension_numbers<[1], [0], [0], [1], [0, 0, 1, 1], [], []>} : vector<128x128xbf16>, vector<128x128xbf16>, vector<128x128xf32> -> vector<128x128xf32>
      %22 = arith.addf %17, %21 : vector<128x128xf32>
      %c0_12 = arith.constant 0 : index
      %c0_13 = arith.constant 0 : index
      %23 = vector.load %arg7[%c0_12, %c0_13] : memref<1x128xf32, #tpu.memory_space<vmem>>, vector<1x128xf32>
      %24 = vector.broadcast %23 : vector<1x128xf32> to vector<128x128xf32>
      %25 = arith.addf %22, %24 : vector<128x128xf32>
      %cst_14 = arith.constant 0.000000e+00 : f32
      %26 = vector.broadcast %cst_14 : f32 to vector<128x128xf32>
      %27 = arith.maximumf %25, %26 : vector<128x128xf32>
      %28 = arith.truncf %27 : vector<128x128xf32> to vector<128x128xbf16>
      %29 = arith.index_cast %1 : i32 to index
      %c0_15 = arith.constant 0 : index
      %30 = vector.load %arg13[%29, %c0_15] : memref<128x128xbf16, #tpu.memory_space<vmem>>, vector<128x128xbf16>
      tpu.vector_store %arg13[%29, %c0_15], %28 {strides = array<i32>} : memref<128x128xbf16, #tpu.memory_space<vmem>>, vector<128x128xbf16>,
      %cst_16 = arith.constant 0.000000e+00 : f32
      %31 = vector.broadcast %cst_16 : f32 to vector<128x128xf32>
      %c0_17 = arith.constant 0 : index
      %c0_18 = arith.constant 0 : index
      %32 = vector.load %arg11[%c0_17, %c0_18] : memref<128x128xf32, #tpu.memory_space<vmem>>, vector<128x128xf32>
      tpu.vector_store %arg11[%c0_17, %c0_18], %31 {strides = array<i32>} : memref<128x128xf32, #tpu.memory_space<vmem>>, vector<128x128xf32>,
    } else {
    }
    %c1_i32 = arith.constant 1 : i32
    %5 = arith.cmpi eq, %arg0, %c1_i32 : i32
    %6 = arith.extui %5 : i1 to i32
    %c0_i32_1 = arith.constant 0 : i32
    %7 = arith.cmpi ne, %6, %c0_i32_1 : i32
    scf.if %7 {
      %c0_i32_2 = arith.constant 0 : i32
      %8 = arith.cmpi eq, %arg1, %c0_i32_2 : i32
      %9 = arith.extui %8 : i1 to i32
      %c0_i32_3 = arith.constant 0 : i32
      %10 = arith.cmpi ne, %9, %c0_i32_3 : i32
      scf.if %10 {
        %c0_16 = arith.constant 0 : index
        %c0_17 = arith.constant 0 : index
        %27 = vector.load %arg13[%c0_16, %c0_17] : memref<128x128xbf16, #tpu.memory_space<vmem>>, vector<128x128xbf16>
        %c0_18 = arith.constant 0 : index
        %c0_19 = arith.constant 0 : index
        %28 = vector.load %arg9[%c0_18, %c0_19] : memref<128x128xbf16, #tpu.memory_space<vmem>>, vector<128x128xbf16>
        %cst_20 = arith.constant dense<0.000000e+00> : vector<128x128xf32>
        %29 = tpu.matmul %27, %28, %cst_20 {dimension_numbers = #tpu.dot_dimension_numbers<[1], [0], [0], [1], [0, 0, 1, 1], [], []>} : vector<128x128xbf16>, vector<128x128xbf16>, vector<128x128xf32> -> vector<128x128xf32>
        %30 = arith.truncf %29 : vector<128x128xf32> to vector<128x128xbf16>
        %c0_21 = arith.constant 0 : index
        %c0_22 = arith.constant 0 : index
        %31 = vector.load %arg12[%c0_21, %c0_22] : memref<128x128xbf16, #tpu.memory_space<vmem>>, vector<128x128xbf16>
        tpu.vector_store %arg12[%c0_21, %c0_22], %30 {strides = array<i32>} : memref<128x128xbf16, #tpu.memory_space<vmem>>, vector<128x128xbf16>,
      } else {
      }
      %c0 = arith.constant 0 : index
      %c0_4 = arith.constant 0 : index
      %11 = vector.load %arg2[%c0, %c0_4] : memref<128x128xbf16, #tpu.memory_space<vmem>>, vector<128x128xbf16>
      %c0_5 = arith.constant 0 : index
      %c0_6 = arith.constant 0 : index
      %12 = vector.load %arg12[%c0_5, %c0_6] : memref<128x128xbf16, #tpu.memory_space<vmem>>, vector<128x128xbf16>
      %cst = arith.constant dense<0.000000e+00> : vector<128x128xf32>
      %13 = tpu.matmul %11, %12, %cst {dimension_numbers = #tpu.dot_dimension_numbers<[1], [0], [0], [1], [0, 0, 1, 1], [], []>} : vector<128x128xbf16>, vector<128x128xbf16>, vector<128x128xf32> -> vector<128x128xf32>
      %14 = arith.index_cast %1 : i32 to index
      %c0_7 = arith.constant 0 : index
      %15 = vector.load %arg3[%14, %c0_7] : memref<128x1xf32, #tpu.memory_space<vmem>>, vector<128x1xf32>
      %16 = vector.broadcast %15 : vector<128x1xf32> to vector<128x128xf32>
      %17 = arith.mulf %13, %16 : vector<128x128xf32>
      %18 = arith.index_cast %1 : i32 to index
      %c0_8 = arith.constant 0 : index
      %19 = vector.load %arg13[%18, %c0_8] : memref<128x128xbf16, #tpu.memory_space<vmem>>, vector<128x128xbf16>
      %c0_9 = arith.constant 0 : index
      %c0_10 = arith.constant 0 : index
      %20 = vector.load %arg8[%c0_9, %c0_10] : memref<128x128xbf16, #tpu.memory_space<vmem>>, vector<128x128xbf16>
      %cst_11 = arith.constant dense<0.000000e+00> : vector<128x128xf32>
      %21 = tpu.matmul %19, %20, %cst_11 {dimension_numbers = #tpu.dot_dimension_numbers<[1], [0], [0], [1], [0, 0, 1, 1], [], []>} : vector<128x128xbf16>, vector<128x128xbf16>, vector<128x128xf32> -> vector<128x128xf32>
      %22 = arith.addf %17, %21 : vector<128x128xf32>
      %c0_12 = arith.constant 0 : index
      %c0_13 = arith.constant 0 : index
      %23 = vector.load %arg10[%c0_12, %c0_13] : memref<1x128xf32, #tpu.memory_space<vmem>>, vector<1x128xf32>
      %24 = vector.broadcast %23 : vector<1x128xf32> to vector<128x128xf32>
      %25 = arith.addf %22, %24 : vector<128x128xf32>
      %c0_14 = arith.constant 0 : index
      %c0_15 = arith.constant 0 : index
      %26 = vector.load %arg11[%c0_14, %c0_15] : memref<128x128xf32, #tpu.memory_space<vmem>>, vector<128x128xf32>
      tpu.vector_store %arg11[%c0_14, %c0_15], %25 {strides = array<i32>} : memref<128x128xf32, #tpu.memory_space<vmem>>, vector<128x128xf32>,
    } else {
    }
    return
  }
  func.func @transform_0(%arg0: i32, %arg1: i32) -> (i32, i32) {
    %c0_i32 = arith.constant 0 : i32
    %c0_i32_0 = arith.constant 0 : i32
    return %arg1, %c0_i32 : i32, i32
  }
  func.func @transform_1(%arg0: i32, %arg1: i32) -> (i32, i32) {
    %c0_i32 = arith.constant 0 : i32
    %c0_i32_0 = arith.constant 0 : i32
    %c0_i32_1 = arith.constant 0 : i32
    return %c0_i32, %c0_i32_0 : i32, i32
  }
  func.func @transform_2(%arg0: i32, %arg1: i32) -> (i32, i32) {
    %c0_i32 = arith.constant 0 : i32
    %c0_i32_0 = arith.constant 0 : i32
    %c0_i32_1 = arith.constant 0 : i32
    return %c0_i32, %c0_i32_0 : i32, i32
  }
  func.func @transform_3(%arg0: i32, %arg1: i32) -> (i32, i32) {
    %c0_i32 = arith.constant 0 : i32
    %c0_i32_0 = arith.constant 0 : i32
    %c0_i32_1 = arith.constant 0 : i32
    return %c0_i32, %c0_i32_0 : i32, i32
  }
  func.func @transform_4(%arg0: i32, %arg1: i32) -> (i32, i32) {
    %c0_i32 = arith.constant 0 : i32
    %c0_i32_0 = arith.constant 0 : i32
    %c0_i32_1 = arith.constant 0 : i32
    return %c0_i32, %c0_i32_0 : i32, i32
  }
  func.func @transform_5(%arg0: i32, %arg1: i32) -> (i32, i32) {
    %c0_i32 = arith.constant 0 : i32
    %c0_i32_0 = arith.constant 0 : i32
    %c0_i32_1 = arith.constant 0 : i32
    return %c0_i32, %c0_i32_0 : i32, i32
  }
  func.func @transform_6(%arg0: i32, %arg1: i32) -> (i32, i32) {
    %c0_i32 = arith.constant 0 : i32
    %c0_i32_0 = arith.constant 0 : i32
    %c0_i32_1 = arith.constant 0 : i32
    return %c0_i32, %c0_i32_0 : i32, i32
  }
  func.func @transform_7(%arg0: i32, %arg1: i32) -> (i32, i32) {
    %c0_i32 = arith.constant 0 : i32
    %c0_i32_0 = arith.constant 0 : i32
    %c0_i32_1 = arith.constant 0 : i32
    return %c0_i32, %c0_i32_0 : i32, i32
  }
  func.func @transform_8(%arg0: i32, %arg1: i32) -> (i32, i32) {
    %c0_i32 = arith.constant 0 : i32
    %c0_i32_0 = arith.constant 0 : i32
    %c0_i32_1 = arith.constant 0 : i32
    return %c0_i32, %c0_i32_0 : i32, i32
  }
  func.func @transform_9(%arg0: i32, %arg1: i32) -> (i32, i32) {
    %c0_i32 = arith.constant 0 : i32
    %c0_i32_0 = arith.constant 0 : i32
    return %arg1, %c0_i32 : i32, i32
  }
}

</mosaic_0001>

<bundles_post_ra>
// kernel: graphsage_forward.1
= control target key start
LH: loop header
LB: loop body
LE: loop exit
PB: predicated region body
PF: predicated region fallthrough
CT: control target
= control target key end

     0   :  { %s2745_s30 = smov 0   ;;  %s2747_s10 = smov 0   ;;  %s3278_s0 = inlined_call_operand.vmem [shape: bf16[128,128], index: 0, kind: input, shape index: {}]   ;;  %s3279_s1 = inlined_call_operand.vmem [shape: f32[128,1], index: 1, kind: input, shape index: {}]   ;;  %s3280_s2 = inlined_call_operand.vmem [shape: bf16[128,128], index: 2, kind: input, shape index: {}]   ;;  %s3281_s3 = inlined_call_operand.vmem [shape: bf16[128,128], index: 3, kind: input, shape index: {}]   ;;  %s3282_s4 = inlined_call_operand.vmem [shape: bf16[128,128], index: 4, kind: input, shape index: {}]   ;;  %s3283_s5 = inlined_call_operand.vmem [shape: f32[1,128], index: 5, kind: input, shape index: {}]   ;;  %s3284_s6 = inlined_call_operand.vmem [shape: bf16[128,128], index: 6, kind: input, shape index: {}]   ;;  %s3285_s7 = inlined_call_operand.vmem [shape: bf16[128,128], index: 7, kind: input, shape index: {}]   ;;  %s3286_s8 = inlined_call_operand.vmem [shape: f32[1,128], index: 8, kind: input, shape index: {}]   ;;  %s3287_s9 = inlined_call_operand.vmem [shape: f32[128,128], index: 9, kind: output, shape index: {}]  }
   0x1   :  { %s2749_s11 = smov 0  }
   0x2 LB: > { %s31_s12 = sadd.s32 1, %s2686_s10  ;;  %p1957_p0 = scmp.ge.s32.totalorder %s2690_s11, 1  ;;  %s2690_s11 = sphi %s2749_s11, %s19_s11   ;;  %s2686_s10 = sphi %s2747_s10, %s3289_s10   ;;  %s2682_s30 = sphi %s2745_s30, %s3288_s30  }
   0x3   : > { %p33_p1 = scmp.ge.s32.totalorder %s31_s12, 2  ;;  %p300_p2 = scmp.lt.s32.totalorder %s2690_s11, 3 }
   0x5   : > { %s3291_s12 = smov (%p33_p1, %s31_s12), 0  ;;  %p301_p3 = pnand %p1957_p0, %p300_p2 }
   0x6   : > { %p1958_p4 = scmp.ne.s32.totalorder (!%p301_p3), %s2682_s30, 0 }
   0x7   : > { %304 = sbr.rel (%p301_p3) target bundleno = 1028 (0x404), region = 56 }
   0xc   : > { %352 = sbr.rel (%p1958_p4) target bundleno = 521 (0x209), region = 60 }
  0x11   : > { %v2363_v0 = vld [vmem:[%s3282_s4 + $0x38] sm:$0xff]  ;;  %v2362_v1 = vld [vmem:[%s3282_s4 + $0x30] sm:$0xff]  ;;  %v2361_v2 = vld [vmem:[%s3282_s4 + $0x28] sm:$0xff]  ;;  %v2692_v55 = vmov 0  }
  0x12   : > { %485 = vmatpush.bf16.msra.mxu0 %v2363_v0  ;;  %2585 = vmatpush.bf16.msra.mxu3 %v2363_v0  ;;  %v2360_v3 = vld [vmem:[%s3282_s4 + $0x20] sm:$0xff]  ;;  %v2359_v4 = vld [vmem:[%s3282_s4 + $0x18] sm:$0xff]  ;;  %v2358_v5 = vld [vmem:[%s3282_s4 + $0x10] sm:$0xff] }
  0x13   : > { %v2357_v6 = vld [vmem:[%s3282_s4 + $0x8] sm:$0xff]  ;;  %v2356_v7 = vld [vmem:[%s3282_s4] sm:$0xff]  ;;  %v2354_v9 = vld [vmem:[%s3280_s2 + $0x30] sm:$0xff]  ;;  %2660 = vset.pattern.permute.xlu0 %v2692_v55  ;;  %2661 = vset.pattern.permute.xlu1 %v2692_v55 }
  0x14   : > { %v2348_v8 = vld [vmem:[%s3280_s2] sm:$0xff]  ;;  %v2349_v10 = vld [vmem:[%s3280_s2 + $0x8] sm:$0xff]  ;;  %v2355_v11 = vld [vmem:[%s3280_s2 + $0x38] sm:$0xff]  ;;  %2662 = vset.pattern.permute.xlu2 %v2692_v55 }
  0x15   : > { %v2350_v12 = vld [vmem:[%s3280_s2 + $0x10] sm:$0xff]  ;;  %v2351_v13 = vld [vmem:[%s3280_s2 + $0x18] sm:$0xff]  ;;  %v2352_v14 = vld [vmem:[%s3280_s2 + $0x20] sm:$0xff] }
  0x16   : > { %486 = vmatpush.bf16.msra.mxu0 %v2362_v1  ;;  %2586 = vmatpush.bf16.msra.mxu3 %v2362_v1  ;;  %v2353_v15 = vld [vmem:[%s3280_s2 + $0x28] sm:$0xff]  ;;  %v2817_v33 = vld [vmem:[%s3281_s3 + $0x38] sm:$0xff]  ;;  %v2823_v35 = vld [vmem:[%s3281_s3 + $0x30] sm:$0xff] }
  0x17   : > { %988 = vmatpush.bf16.msra.mxu2 %v2817_v33  ;;  %v2829_v36 = vld [vmem:[%s3281_s3 + $0x28] sm:$0xff]  ;;  %v2835_v39 = vld [vmem:[%s3281_s3 + $0x20] sm:$0xff]  ;;  %v2841_v40 = vld [vmem:[%s3281_s3 + $0x18] sm:$0xff] }
  0x18   : > { %v2847_v42 = vld [vmem:[%s3281_s3 + $0x10] sm:$0xff]  ;;  %v2853_v43 = vld [vmem:[%s3281_s3 + $0x8] sm:$0xff]  ;;  %v2859_v46 = vld [vmem:[%s3281_s3] sm:$0xff] }
  0x19   : > { %v2380_v47 = vld [vmem:[%s3280_s2] sm:$0xff]  ;;  %v2381_v51 = vld [vmem:[%s3280_s2 + $0x8] sm:$0xff]  ;;  %v746_v53 = vld [vmem:[%s3279_s1 + $0x10] sm:$0xff] }
  0x1a   : > { %487 = vmatpush.bf16.msra.mxu0 %v2361_v2  ;;  %2587 = vmatpush.bf16.msra.mxu3 %v2361_v2  ;;  %v744_v52 = vld [vmem:[%s3279_s1] sm:$0xff]  ;;  %v745_v58 = vld [vmem:[%s3279_s1 + $0x8] sm:$0xff]  ;;  %v2382_v59 = vld [vmem:[%s3280_s2 + $0x10] sm:$0xff] }
  0x1b   : > { %989 = vmatpush.bf16.msra.mxu2 %v2823_v35  ;;  %762 = vperm.xlu0 %2660, %v744_v52   ;;  %v747_v60 = vld [vmem:[%s3279_s1 + $0x18] sm:$0xff]  ;;  %v750_v0 = vld [vmem:[%s3279_s1 + $0x30] sm:$0xff]  ;;  %v2364_v2 = vld [vmem:[%s3278_s0] sm:$0xff] }
  0x1c   : > { %772 = vperm.xlu1 %2661, %v746_v53   ;;  %v751_v63 = vld [vmem:[%s3279_s1 + $0x38] sm:$0xff] }
  0x1e   : > { %488 = vmatpush.bf16.msra.mxu0 %v2360_v3  ;;  %2588 = vmatpush.bf16.msra.mxu3 %v2360_v3  ;;  %v2370_v3 = vld [vmem:[%s3278_s0 + $0x30] sm:$0xff] }
  0x1f   : > { %990 = vmatpush.bf16.msra.mxu2 %v2829_v36 }
  0x22   : > { %489 = vmatpush.bf16.msra.mxu0 %v2359_v4  ;;  %2589 = vmatpush.bf16.msra.mxu3 %v2359_v4  ;;  %v2383_v4 = vld [vmem:[%s3280_s2 + $0x18] sm:$0xff] }
  0x23   : > { %991 = vmatpush.bf16.msra.mxu2 %v2835_v39  ;;  %767 = vperm.xlu0 %2660, %v745_v58  }
  0x24   : > { %777 = vperm.xlu1 %2661, %v747_v60  }
  0x26   : > { %490 = vmatpush.bf16.msra.mxu0 %v2358_v5  ;;  %2590 = vmatpush.bf16.msra.mxu3 %v2358_v5  ;;  %v754_v5 = vld [vmem:[%s3279_s1 + $0x50] sm:$0xff] }
  0x27   : > { %992 = vmatpush.bf16.msra.mxu2 %v2841_v40 }
  0x2a   : > { %491 = vmatpush.bf16.msra.mxu0 %v2357_v6  ;;  %2591 = vmatpush.bf16.msra.mxu3 %v2357_v6  ;;  %v753_v6 = vld [vmem:[%s3279_s1 + $0x48] sm:$0xff] }
  0x2b   : > { %993 = vmatpush.bf16.msra.mxu2 %v2847_v42  ;;  %792 = vperm.xlu0 %2660, %v750_v0  }
  0x2c   : > { %797 = vperm.xlu1 %2661, %v751_v63  }
  0x2e   : > { %492 = vmatpush.bf16.msra.mxu0 %v2356_v7  ;;  %2592 = vmatpush.bf16.msra.mxu3 %v2356_v7  ;;  %v757_v7 = vld [vmem:[%s3279_s1 + $0x68] sm:$0xff] }
  0x2f   : > { %994 = vmatpush.bf16.msra.mxu2 %v2853_v43 }
  0x31   : > { %493 = vmatmul.bf16.vlgmr.msra.gmra.mxu0 %v2348_v8  ;;  %523 = vmatmul.bf16.vlgmr.msra.gmra.mxu3 %v2354_v9  ;;  %v756_v8 = vld [vmem:[%s3279_s1 + $0x60] sm:$0xff]  ;;  %v2365_v9 = vld [vmem:[%s3278_s0 + $0x8] sm:$0xff] }
  0x33   : > { %995 = vmatpush.bf16.msra.mxu2 %v2859_v46  ;;  %807 = vperm.xlu0 %2660, %v753_v6  }
  0x34   : > { %812 = vperm.xlu1 %2661, %v754_v5  }
  0x36   : > { %996 = vmatmul.bf16.vlgmr.msra.gmra.mxu2 %v2380_v47 }
  0x3b   : > { %822 = vperm.xlu0 %2660, %v756_v8  }
  0x3c   : > { %827 = vperm.xlu1 %2661, %v757_v7  }
  0x41   : > { %498 = vmatmul.bf16.gmra.mxu0 %v2349_v10  ;;  %528 = vmatmul.bf16.gmra.mxu3 %v2355_v11  ;;  %v2371_v10 = vld [vmem:[%s3278_s0 + $0x38] sm:$0xff]  ;;  %v2384_v11 = vld [vmem:[%s3280_s2 + $0x20] sm:$0xff] }
  0x46   : > { %1001 = vmatmul.bf16.gmra.mxu2 %v2381_v51 }
  0x51   : > { %503 = vmatmul.bf16.gmra.mxu0 %v2350_v12  ;;  %v748_v12 = vld [vmem:[%s3279_s1 + $0x20] sm:$0xff] }
  0x52   : > { %782 = vperm.xlu2 %2662, %v748_v12  }
  0x56   : > { %1006 = vmatmul.bf16.gmra.mxu2 %v2382_v59 }
  0x61   : > { %508 = vmatmul.bf16.gmra.mxu0 %v2351_v13  ;;  %v759_v13 = vld [vmem:[%s3279_s1 + $0x78] sm:$0xff] }
  0x62   : > { %837 = vperm.xlu0 %2660, %v759_v13  }
  0x66   : > { %1011 = vmatmul.bf16.gmra.mxu2 %v2383_v4 }
  0x71   : > { %513 = vmatmul.bf16.gmra.mxu0 %v2352_v14  ;;  %v749_v14 = vld [vmem:[%s3279_s1 + $0x28] sm:$0xff] }
  0x72   : > { %787 = vperm.xlu2 %2662, %v749_v14  }
  0x76   : > { %1016 = vmatmul.bf16.gmra.mxu2 %v2384_v11 }
  0x81   : > { %518 = vmatmul.bf16.gmra.mxu0 %v2353_v15  ;;  %v2366_v15 = vld [vmem:[%s3278_s0 + $0x10] sm:$0xff] }
  0xae   : > { %v494_v16 = vpop.f32.mrf.mxu0 }
  0xb4   : > { %v524_v17 = vpop.f32.mrf.mxu3 }
  0xb6   : > { %v496_v18 = vpop.f32.mrf.mxu0 }
  0xb7   : > { %v2447_v19 = vpack.c.bf16 %v496_v18, %v494_v16  ;;  %v2386_v16 = vld [vmem:[%s3280_s2 + $0x30] sm:$0xff]  ;;  %v752_v18 = vld [vmem:[%s3279_s1 + $0x40] sm:$0xff] }
  0xb8   : > { %802 = vperm.xlu2 %2662, %v752_v18  }
  0xb9   : > { %2448 = vst [vmem:[#allocation2 + $0x30] sm:$0xff] %v2447_v19   ;;  %v755_v19 = vld [vmem:[%s3279_s1 + $0x58] sm:$0xff] }
  0xbc   : > { %v526_v20 = vpop.f32.mrf.mxu3 }
  0xbd   : > { %v2477_v21 = vpack.c.bf16 %v526_v20, %v524_v17  ;;  %v2385_v17 = vld [vmem:[%s3280_s2 + $0x28] sm:$0xff]  ;;  %v2367_v20 = vld [vmem:[%s3278_s0 + $0x18] sm:$0xff] }
  0xbe   : > { %v499_v22 = vpop.f32.mrf.mxu0  ;;  %1021 = vmatmul.bf16.gmra.mxu2 %v2385_v17 }
  0xbf   : > { %2569 = vst [vmem:[#allocation2 + $0x28] sm:$0xff] %v2477_v21   ;;  %v2387_v21 = vld [vmem:[%s3280_s2 + $0x38] sm:$0xff] }
  0xc0   : > { %v2372_v1 = vld [vmem:[#allocation2 + $0x30] sm:$0xff]  ;;  %817 = vperm.xlu2 %2662, %v755_v19  }
  0xc4   : > { %v529_v23 = vpop.f32.mrf.mxu3 }
  0xc6   : > { %v501_v24 = vpop.f32.mrf.mxu0  ;;  %v2378_v32 = vld [vmem:[#allocation2 + $0x28] sm:$0xff] }
  0xc7   : > { %v2452_v25 = vpack.c.bf16 %v501_v24, %v499_v22  ;;  %v758_v22 = vld [vmem:[%s3279_s1 + $0x70] sm:$0xff]  ;;  %v2369_v24 = vld [vmem:[%s3278_s0 + $0x28] sm:$0xff] }
  0xc8   : > { %832 = vperm.xlu2 %2662, %v758_v22  }
  0xc9   : > { %2564 = vst [vmem:[#allocation2] sm:$0xff] %v2452_v25   ;;  %v997_v25 = vpop.f32.mrf.mxu2 }
  0xcc   : > { %v531_v26 = vpop.f32.mrf.mxu3 }
  0xcd   : > { %v2482_v27 = vpack.c.bf16 %v531_v26, %v529_v23  ;;  %v2368_v23 = vld [vmem:[%s3278_s0 + $0x20] sm:$0xff] }
  0xce   : > { %v504_v28 = vpop.f32.mrf.mxu0 }
  0xcf   : > { %2570 = vst [vmem:[#allocation2 + $0x38] sm:$0xff] %v2482_v27   ;;  %v763_v27 = vpop.permute.xlu0 %762 }
  0xd0   : > { %v2373_v62 = vld [vmem:[#allocation2] sm:$0xff] }
  0xd1   : > { %v999_v26 = vpop.f32.mrf.mxu2 }
  0xd6   : > { %v506_v29 = vpop.f32.mrf.mxu0  ;;  %v2379_v30 = vld [vmem:[#allocation2 + $0x38] sm:$0xff] }
  0xd7   : > { %v2457_v31 = vpack.c.bf16 %v506_v29, %v504_v28  ;;  %694 = vmatpush.bf16.msra.mxu1 %v2379_v30  ;;  %2593 = vmatpush.bf16.msrb.mxu3 %v2379_v30  ;;  %v773_v30 = vpop.permute.xlu1 %772 }
  0xd9   : > { %2565 = vst [vmem:[#allocation2 + $0x18] sm:$0xff] %v2457_v31   ;;  %v1002_v29 = vpop.f32.mrf.mxu2 }
  0xdb   : > { %695 = vmatpush.bf16.msra.mxu1 %v2378_v32  ;;  %2594 = vmatpush.bf16.msrb.mxu3 %v2378_v32 }
  0xde   : > { %v509_v34 = vpop.f32.mrf.mxu0 }
  0xe0   : > { %v2374_v61 = vld [vmem:[#allocation2 + $0x18] sm:$0xff] }
  0xe6   : > { %v511_v37 = vpop.f32.mrf.mxu0 }
  0xe7   : > { %v2462_v38 = vpack.c.bf16 %v511_v37, %v509_v34 }
  0xe9   : > { %2566 = vst [vmem:[#allocation2 + $0x10] sm:$0xff] %v2462_v38   ;;  %v1004_v38 = vpop.f32.mrf.mxu2 }
  0xee   : > { %v514_v41 = vpop.f32.mrf.mxu0 }
  0xf0   : > { %v2375_v57 = vld [vmem:[#allocation2 + $0x10] sm:$0xff] }
  0xf1   : > { %v1007_v51 = vpop.f32.mrf.mxu2 }
  0xf6   : > { %v516_v44 = vpop.f32.mrf.mxu0 }
  0xf7   : > { %v2467_v45 = vpack.c.bf16 %v516_v44, %v514_v41  ;;  %v778_v41 = vpop.permute.xlu1 %777  ;;  %v783_v44 = vpop.permute.xlu2 %782 }
  0xf9   : > { %2567 = vst [vmem:[#allocation2 + $0x8] sm:$0xff] %v2467_v45   ;;  %v1009_v63 = vpop.f32.mrf.mxu2 }
  0xfe   : > { %v519_v48 = vpop.f32.mrf.mxu0 }
  0xff   : > { %v798_v52 = vpop.permute.xlu1 %797 }
 0x100   : > { %v2376_v56 = vld [vmem:[#allocation2 + $0x8] sm:$0xff] }
 0x101   : > { %v1012_v11 = vpop.f32.mrf.mxu2 }
 0x106   : > { %v521_v49 = vpop.f32.mrf.mxu0 }
 0x107   : > { %v2472_v50 = vpack.c.bf16 %v521_v49, %v519_v48 }
 0x109   : > { %2568 = vst [vmem:[#allocation2 + $0x20] sm:$0xff] %v2472_v50  }
 0x110   : > { %v2377_v54 = vld [vmem:[#allocation2 + $0x20] sm:$0xff] }
 0x111   : > { %696 = vmatpush.bf16.msra.mxu1 %v2377_v54  ;;  %2595 = vmatpush.bf16.msrb.mxu3 %v2377_v54 }
 0x115   : > { %697 = vmatpush.bf16.msra.mxu1 %v2376_v56  ;;  %2596 = vmatpush.bf16.msrb.mxu3 %v2376_v56  ;;  %v788_v56 = vpop.permute.xlu2 %787 }
 0x119   : > { %698 = vmatpush.bf16.msra.mxu1 %v2375_v57  ;;  %2597 = vmatpush.bf16.msrb.mxu3 %v2375_v57 }
 0x11d   : > { %699 = vmatpush.bf16.msra.mxu1 %v2374_v61  ;;  %2598 = vmatpush.bf16.msrb.mxu3 %v2374_v61  ;;  %v803_v5 = vpop.permute.xlu2 %802 }
 0x121   : > { %700 = vmatpush.bf16.msra.mxu1 %v2373_v62  ;;  %2599 = vmatpush.bf16.msrb.mxu3 %v2373_v62 }
 0x125   : > { %701 = vmatpush.bf16.msra.mxu1 %v2372_v1  ;;  %2600 = vmatpush.bf16.msrb.mxu3 %v2372_v1  ;;  %v2980_v18 = vpop.permute.xlu2 %817 }
 0x128   : > { %702 = vmatmul.bf16.vlgmr.msra.gmra.mxu1 %v2364_v2  ;;  %732 = vmatmul.bf16.vlgmr.msrb.gmra.mxu3 %v2370_v3  ;;  %v2977_v2 = vpop.permute.xlu1 %812 }
 0x129   : > { %2601 = vmatpush.bf16.msra.mxu3 %v2817_v33  ;;  %v768_v33 = vpop.permute.xlu0 %767 }
 0x12d   : > { %2602 = vmatpush.bf16.msra.mxu3 %v2823_v35  ;;  %v2969_v35 = vld [vmem:[%s3283_s5] ss:$0 sm:$0xff] }
 0x130   : > { %v828_v14 = vpop.permute.xlu1 %827 }
 0x131   : > { %2603 = vmatpush.bf16.msra.mxu3 %v2829_v36  ;;  %v793_v49 = vpop.permute.xlu0 %792 }
 0x135   : > { %2604 = vmatpush.bf16.msra.mxu3 %v2835_v39 }
 0x138   : > { %707 = vmatmul.bf16.gmra.mxu1 %v2365_v9  ;;  %737 = vmatmul.bf16.gmra.mxu3 %v2371_v10 }
 0x139   : > { %2605 = vmatpush.bf16.msra.mxu3 %v2841_v40  ;;  %v2974_v60 = vpop.permute.xlu0 %807 }
 0x13d   : > { %2606 = vmatpush.bf16.msra.mxu3 %v2847_v42 }
 0x141   : > { %2607 = vmatpush.bf16.msra.mxu3 %v2853_v43  ;;  %v823_v7 = vpop.permute.xlu0 %822 }
 0x145   : > { %2608 = vmatpush.bf16.msra.mxu3 %v2859_v46 }
 0x148   : > { %712 = vmatmul.bf16.gmra.mxu1 %v2366_v15  ;;  %1026 = vmatmul.bf16.vlgmr.msra.gmra.mxu3 %v2386_v16 }
 0x158   : > { %717 = vmatmul.bf16.gmra.mxu1 %v2367_v20  ;;  %1031 = vmatmul.bf16.gmra.mxu3 %v2387_v21 }
 0x168   : > { %722 = vmatmul.bf16.gmra.mxu1 %v2368_v23 }
 0x178   : > { %727 = vmatmul.bf16.gmra.mxu1 %v2369_v24 }
 0x1a5   : > { %v703_v28 = vpop.f32.mrf.mxu1 }
 0x1a6   : > { %v840_v31 = vmul.f32 %v763_v27, %v703_v28 }
 0x1a8   : > { %v1037_v34 = vadd.f32 %v997_v25, %v840_v31 }
 0x1aa   : > { %v1057_v39 = vadd.f32 %v2969_v35, %v1037_v34  ;;  %v833_v34 = vpop.permute.xlu2 %832 }
 0x1ab   : > { %v733_v32 = vpop.f32.mrf.mxu3 }
 0x1ac   : > { %v1073_v45 = vmax.f32 %v1057_v39, 0.0  ;;  %v852_v12 = vmul.f32 %v823_v7, %v733_v32 }
 0x1ad   : > { %v705_v36 = vpop.f32.mrf.mxu1 }
 0x1ae   : > { %v841_v37 = vmul.f32 %v768_v33, %v705_v36 }
 0x1b0   : > { %v1038_v40 = vadd.f32 %v999_v26, %v841_v37 }
 0x1b2   : > { %v1058_v42 = vadd.f32 %v2969_v35, %v1038_v40 }
 0x1b3   : > { %v735_v43 = vpop.f32.mrf.mxu3 }
 0x1b4   : > { %v1074_v46 = vmax.f32 %v1058_v42, 0.0  ;;  %v853_v19 = vmul.f32 %v828_v14, %v735_v43 }
 0x1b5   : > { %v708_v47 = vpop.f32.mrf.mxu1 }
 0x1b6   : > { %v2487_v48 = vpack.c.bf16 %v1074_v46, %v1073_v45  ;;  %v842_v50 = vmul.f32 %v773_v30, %v708_v47 }
 0x1b8   : > { %2488 = vst [vmem:[#allocation3] sm:$0xff] %v2487_v48   ;;  %v1039_v54 = vadd.f32 %v1002_v29, %v842_v50  ;;  %v1014_v29 = vpop.f32.mrf.mxu2 }
 0x1ba   : > { %v1059_v58 = vadd.f32 %v2969_v35, %v1039_v54 }
 0x1bb   : > { %v738_v53 = vpop.f32.mrf.mxu3 }
 0x1bc   : > { %v1075_v0 = vmax.f32 %v1059_v58, 0.0  ;;  %v854_v39 = vmul.f32 %v833_v34, %v738_v53 }
 0x1bd   : > { %v710_v55 = vpop.f32.mrf.mxu1 }
 0x1be   : > { %v843_v57 = vmul.f32 %v778_v41, %v710_v55  ;;  %v838_v41 = vpop.permute.xlu0 %837 }
 0x1c0   : > { %v1040_v59 = vadd.f32 %v1004_v38, %v843_v57  ;;  %v1017_v45 = vpop.f32.mrf.mxu2 }
 0x1c2   : > { %v1060_v61 = vadd.f32 %v2969_v35, %v1040_v59  ;;  %v2693_v59 = vmov 0.0  }
 0x1c3   : > { %v740_v62 = vpop.f32.mrf.mxu3  ;;  %1123 = vst [vmem:[%s3287_s9] sm:$0xff] %v2693_v59 }
 0x1c4   : > { %v1076_v1 = vmax.f32 %v1060_v61, 0.0  ;;  %v855_v46 = vmul.f32 %v838_v41, %v740_v62  ;;  %1124 = vst [vmem:[%s3287_s9 + $0x8] sm:$0xff] %v2693_v59 }
 0x1c5   : > { %v713_v3 = vpop.f32.mrf.mxu1  ;;  %1125 = vst [vmem:[%s3287_s9 + $0x10] sm:$0xff] %v2693_v59 }
 0x1c6   : > { %v2492_v4 = vpack.c.bf16 %v1076_v1, %v1075_v0  ;;  %v844_v6 = vmul.f32 %v783_v44, %v713_v3  ;;  %1126 = vst [vmem:[%s3287_s9 + $0x18] sm:$0xff] %v2693_v59 }
 0x1c7   : > { %1127 = vst [vmem:[%s3287_s9 + $0x20] sm:$0xff] %v2693_v59 }
 0x1c8   : > { %2571 = vst [vmem:[#allocation3 + $0x18] sm:$0xff] %v2492_v4   ;;  %v1041_v9 = vadd.f32 %v1007_v51, %v844_v6  ;;  %v1019_v62 = vpop.f32.mrf.mxu2 }
 0x1c9   : > { %1128 = vst [vmem:[%s3287_s9 + $0x28] sm:$0xff] %v2693_v59 }
 0x1ca   : > { %v1061_v15 = vadd.f32 %v2969_v35, %v1041_v9  ;;  %1129 = vst [vmem:[%s3287_s9 + $0x30] sm:$0xff] %v2693_v59 }
 0x1cb   : > { %v1027_v8 = vpop.f32.mrf.mxu3  ;;  %1130 = vst [vmem:[%s3287_s9 + $0x38] sm:$0xff] %v2693_v59 }
 0x1cc   : > { %v1049_v16 = vadd.f32 %v1027_v8, %v852_v12  ;;  %v1077_v22 = vmax.f32 %v1061_v15, 0.0  ;;  %1131 = vst [vmem:[%s3287_s9 + $0x40] sm:$0xff] %v2693_v59 }
 0x1cd   : > { %v715_v10 = vpop.f32.mrf.mxu1  ;;  %1132 = vst [vmem:[%s3287_s9 + $0x48] sm:$0xff] %v2693_v59 }
 0x1ce   : > { %v845_v13 = vmul.f32 %v788_v56, %v715_v10  ;;  %v1069_v23 = vadd.f32 %v2969_v35, %v1049_v16  ;;  %1133 = vst [vmem:[%s3287_s9 + $0x50] sm:$0xff] %v2693_v59 }
 0x1cf   : > { %1134 = vst [vmem:[%s3287_s9 + $0x58] sm:$0xff] %v2693_v59 }
 0x1d0   : > { %v1042_v17 = vadd.f32 %v1009_v63, %v845_v13  ;;  %v1085_v30 = vmax.f32 %v1069_v23, 0.0  ;;  %v1022_v7 = vpop.f32.mrf.mxu2  ;;  %1135 = vst [vmem:[%s3287_s9 + $0x60] sm:$0xff] %v2693_v59 }
 0x1d1   : > { %1136 = vst [vmem:[%s3287_s9 + $0x68] sm:$0xff] %v2693_v59 }
 0x1d2   : > { %v1062_v20 = vadd.f32 %v2969_v35, %v1042_v17  ;;  %1137 = vst [vmem:[%s3287_s9 + $0x70] sm:$0xff] %v2693_v59 }
 0x1d3   : > { %v1029_v21 = vpop.f32.mrf.mxu3  ;;  %1138 = vst [vmem:[%s3287_s9 + $0x78] sm:$0xff] %v2693_v59 }
 0x1d4   : > { %v1078_v24 = vmax.f32 %v1062_v20, 0.0  ;;  %v1050_v25 = vadd.f32 %v1029_v21, %v853_v19 }
 0x1d5   : > { %v718_v26 = vpop.f32.mrf.mxu1 }
 0x1d6   : > { %v2497_v27 = vpack.c.bf16 %v1078_v24, %v1077_v22  ;;  %v1070_v28 = vadd.f32 %v2969_v35, %v1050_v25  ;;  %v846_v32 = vmul.f32 %v793_v49, %v718_v26 }
 0x1d8   : > { %2572 = vst [vmem:[#allocation3 + $0x10] sm:$0xff] %v2497_v27   ;;  %v1086_v31 = vmax.f32 %v1070_v28, 0.0  ;;  %v1043_v37 = vadd.f32 %v1012_v11, %v846_v32  ;;  %v1024_v14 = vpop.f32.mrf.mxu2 }
 0x1da   : > { %v2517_v33 = vpack.c.bf16 %v1086_v31, %v1085_v30  ;;  %v1063_v42 = vadd.f32 %v2969_v35, %v1043_v37 }
 0x1db   : > { %v1032_v36 = vpop.f32.mrf.mxu3 }
 0x1dc   : > { %2576 = vst [vmem:[#allocation3 + $0x30] sm:$0xff] %v2517_v33   ;;  %v1051_v43 = vadd.f32 %v1032_v36, %v854_v39  ;;  %v1079_v50 = vmax.f32 %v1063_v42, 0.0 }
 0x1dd   : > { %v720_v38 = vpop.f32.mrf.mxu1 }
 0x1de   : > { %v847_v40 = vmul.f32 %v798_v52, %v720_v38  ;;  %v1071_v49 = vadd.f32 %v2969_v35, %v1051_v43 }
 0x1e0   : > { %v1044_v44 = vadd.f32 %v1014_v29, %v847_v40  ;;  %v1087_v52 = vmax.f32 %v1071_v49, 0.0 }
 0x1e2   : > { %v1064_v47 = vadd.f32 %v2969_v35, %v1044_v44 }
 0x1e3   : > { %v1034_v48 = vpop.f32.mrf.mxu3 }
 0x1e4   : > { %v1080_v51 = vmax.f32 %v1064_v47, 0.0  ;;  %v1052_v54 = vadd.f32 %v1034_v48, %v855_v46 }
 0x1e5   : > { %v723_v55 = vpop.f32.mrf.mxu1 }
 0x1e6   : > { %v2502_v56 = vpack.c.bf16 %v1080_v51, %v1079_v50  ;;  %v1072_v53 = vadd.f32 %v2969_v35, %v1052_v54  ;;  %v848_v58 = vmul.f32 %v803_v5, %v723_v55 }
 0x1e8   : > { %2573 = vst [vmem:[#allocation3 + $0x20] sm:$0xff] %v2502_v56   ;;  %v1088_v57 = vmax.f32 %v1072_v53, 0.0  ;;  %v1045_v63 = vadd.f32 %v1017_v45, %v848_v58 }
 0x1ea   : > { %v2522_v61 = vpack.c.bf16 %v1088_v57, %v1087_v52  ;;  %v1065_v3 = vadd.f32 %v2969_v35, %v1045_v63 }
 0x1ec   : > { %2577 = vst [vmem:[#allocation3 + $0x38] sm:$0xff] %v2522_v61   ;;  %v1081_v5 = vmax.f32 %v1065_v3, 0.0 }
 0x1ed   : > { %v725_v0 = vpop.f32.mrf.mxu1 }
 0x1ee   : > { %v849_v1 = vmul.f32 %v2974_v60, %v725_v0 }
 0x1f0   : > { %v1046_v4 = vadd.f32 %v1019_v62, %v849_v1 }
 0x1f2   : > { %v1066_v60 = vadd.f32 %v2969_v35, %v1046_v4 }
 0x1f4   : > { %v1082_v6 = vmax.f32 %v1066_v60, 0.0 }
 0x1f5   : > { %v728_v8 = vpop.f32.mrf.mxu1 }
 0x1f6   : > { %v2507_v9 = vpack.c.bf16 %v1082_v6, %v1081_v5  ;;  %v850_v10 = vmul.f32 %v2977_v2, %v728_v8 }
 0x1f8   : > { %2574 = vst [vmem:[#allocation3 + $0x28] sm:$0xff] %v2507_v9   ;;  %v1047_v11 = vadd.f32 %v1022_v7, %v850_v10 }
 0x1fa   : > { %v1067_v15 = vadd.f32 %v2969_v35, %v1047_v11 }
 0x1fc   : > { %v1083_v19 = vmax.f32 %v1067_v15, 0.0 }
 0x1fd   : > { %v730_v12 = vpop.f32.mrf.mxu1 }
 0x1fe   : > { %v851_v13 = vmul.f32 %v2980_v18, %v730_v12 }
 0x200   : > { %v1048_v16 = vadd.f32 %v1024_v14, %v851_v13 }
 0x202   : > { %v1068_v17 = vadd.f32 %v2969_v35, %v1048_v16 }
 0x204   : > { %v1084_v2 = vmax.f32 %v1068_v17, 0.0 }
 0x206   : > { %v2512_v20 = vpack.c.bf16 %v1084_v2, %v1083_v19 }
 0x208   : > { %2575 = vst [vmem:[#allocation3 + $0x8] sm:$0xff] %v2512_v20  }
 0x209 PF: > { %p2151_p5 = scmp.ne.s32.totalorder %s2682_s30, 1 }
 0x20b   : > { %1142 = sbr.rel (%p2151_p5) target bundleno = 1028 (0x404), region = 68 }
 0x210   : > { %v2411_v21 = vld [vmem:[%s3285_s7 + $0x38] sm:$0xff]  ;;  %v2410_v18 = vld [vmem:[%s3285_s7 + $0x30] sm:$0xff]  ;;  %v2409_v35 = vld [vmem:[%s3285_s7 + $0x28] sm:$0xff]  ;;  %v2694_v12 = vmov 0  }
 0x211   : > { %1275 = vmatpush.bf16.msra.mxu0 %v2411_v21  ;;  %2609 = vmatpush.bf16.msra.mxu3 %v2411_v21  ;;  %v2408_v22 = vld [vmem:[%s3285_s7 + $0x20] sm:$0xff]  ;;  %v2407_v23 = vld [vmem:[%s3285_s7 + $0x18] sm:$0xff]  ;;  %v2406_v24 = vld [vmem:[%s3285_s7 + $0x10] sm:$0xff] }
 0x212   : > { %v2405_v25 = vld [vmem:[%s3285_s7 + $0x8] sm:$0xff]  ;;  %v2404_v26 = vld [vmem:[%s3285_s7] sm:$0xff]  ;;  %v2402_v28 = vld [vmem:[#allocation3 + $0x30] sm:$0xff]  ;;  %2664 = vset.pattern.permute.xlu0 %v2694_v12  ;;  %2665 = vset.pattern.permute.xlu1 %v2694_v12 }
 0x213   : > { %v2396_v27 = vld [vmem:[#allocation3] sm:$0xff]  ;;  %v2397_v29 = vld [vmem:[#allocation3 + $0x18] sm:$0xff]  ;;  %v2398_v31 = vld [vmem:[#allocation3 + $0x10] sm:$0xff]  ;;  %2666 = vset.pattern.permute.xlu2 %v2694_v12 }
 0x214   : > { %v2403_v30 = vld [vmem:[#allocation3 + $0x38] sm:$0xff]  ;;  %v2399_v32 = vld [vmem:[#allocation3 + $0x20] sm:$0xff]  ;;  %v2400_v33 = vld [vmem:[#allocation3 + $0x28] sm:$0xff] }
 0x215   : > { %1276 = vmatpush.bf16.msra.mxu0 %v2410_v18  ;;  %2610 = vmatpush.bf16.msra.mxu3 %v2410_v18  ;;  %v2401_v34 = vld [vmem:[#allocation3 + $0x8] sm:$0xff]  ;;  %v3072_v55 = vld [vmem:[%s3284_s6 + $0x38] sm:$0xff]  ;;  %v3078_v53 = vld [vmem:[%s3284_s6 + $0x30] sm:$0xff] }
 0x216   : > { %1778 = vmatpush.bf16.msra.mxu2 %v3072_v55  ;;  %v3084_v52 = vld [vmem:[%s3284_s6 + $0x28] sm:$0xff]  ;;  %v3090_v59 = vld [vmem:[%s3284_s6 + $0x20] sm:$0xff]  ;;  %v3096_v61 = vld [vmem:[%s3284_s6 + $0x18] sm:$0xff] }
 0x217   : > { %v3102_v63 = vld [vmem:[%s3284_s6 + $0x10] sm:$0xff]  ;;  %v3108_v0 = vld [vmem:[%s3284_s6 + $0x8] sm:$0xff]  ;;  %v3114_v4 = vld [vmem:[%s3284_s6] sm:$0xff] }
 0x218   : > { %v2428_v60 = vld [vmem:[#allocation3] sm:$0xff]  ;;  %v2429_v8 = vld [vmem:[#allocation3 + $0x18] sm:$0xff]  ;;  %v1536_v10 = vld [vmem:[%s3279_s1 + $0x10] sm:$0xff] }
 0x219   : > { %1277 = vmatpush.bf16.msra.mxu0 %v2409_v35  ;;  %2611 = vmatpush.bf16.msra.mxu3 %v2409_v35  ;;  %v1534_v9 = vld [vmem:[%s3279_s1] sm:$0xff]  ;;  %v1535_v15 = vld [vmem:[%s3279_s1 + $0x8] sm:$0xff]  ;;  %v2430_v16 = vld [vmem:[#allocation3 + $0x10] sm:$0xff] }
 0x21a   : > { %1779 = vmatpush.bf16.msra.mxu2 %v3078_v53  ;;  %1552 = vperm.xlu0 %2664, %v1534_v9   ;;  %v1537_v17 = vld [vmem:[%s3279_s1 + $0x18] sm:$0xff]  ;;  %v1540_v21 = vld [vmem:[%s3279_s1 + $0x30] sm:$0xff]  ;;  %v2412_v35 = vld [vmem:[%s3278_s0] sm:$0xff] }
 0x21b   : > { %1562 = vperm.xlu1 %2665, %v1536_v10   ;;  %v1541_v20 = vld [vmem:[%s3279_s1 + $0x38] sm:$0xff] }
 0x21d   : > { %1278 = vmatpush.bf16.msra.mxu0 %v2408_v22  ;;  %2612 = vmatpush.bf16.msra.mxu3 %v2408_v22  ;;  %v2418_v22 = vld [vmem:[%s3278_s0 + $0x30] sm:$0xff] }
 0x21e   : > { %1780 = vmatpush.bf16.msra.mxu2 %v3084_v52 }
 0x221   : > { %1279 = vmatpush.bf16.msra.mxu0 %v2407_v23  ;;  %2613 = vmatpush.bf16.msra.mxu3 %v2407_v23  ;;  %v2431_v23 = vld [vmem:[#allocation3 + $0x20] sm:$0xff] }
 0x222   : > { %1781 = vmatpush.bf16.msra.mxu2 %v3090_v59  ;;  %1557 = vperm.xlu0 %2664, %v1535_v15  }
 0x223   : > { %1567 = vperm.xlu1 %2665, %v1537_v17  }
 0x225   : > { %1280 = vmatpush.bf16.msra.mxu0 %v2406_v24  ;;  %2614 = vmatpush.bf16.msra.mxu3 %v2406_v24  ;;  %v1544_v24 = vld [vmem:[%s3279_s1 + $0x50] sm:$0xff] }
 0x226   : > { %1782 = vmatpush.bf16.msra.mxu2 %v3096_v61 }
 0x229   : > { %1281 = vmatpush.bf16.msra.mxu0 %v2405_v25  ;;  %2615 = vmatpush.bf16.msra.mxu3 %v2405_v25  ;;  %v1543_v25 = vld [vmem:[%s3279_s1 + $0x48] sm:$0xff] }
 0x22a   : > { %1783 = vmatpush.bf16.msra.mxu2 %v3102_v63  ;;  %1582 = vperm.xlu0 %2664, %v1540_v21  }
 0x22b   : > { %1587 = vperm.xlu1 %2665, %v1541_v20  }
 0x22d   : > { %1282 = vmatpush.bf16.msra.mxu0 %v2404_v26  ;;  %2616 = vmatpush.bf16.msra.mxu3 %v2404_v26  ;;  %v1547_v26 = vld [vmem:[%s3279_s1 + $0x68] sm:$0xff] }
 0x22e   : > { %1784 = vmatpush.bf16.msra.mxu2 %v3108_v0 }
 0x230   : > { %1283 = vmatmul.bf16.vlgmr.msra.gmra.mxu0 %v2396_v27  ;;  %1313 = vmatmul.bf16.vlgmr.msra.gmra.mxu3 %v2402_v28  ;;  %v1546_v27 = vld [vmem:[%s3279_s1 + $0x60] sm:$0xff]  ;;  %v2413_v28 = vld [vmem:[%s3278_s0 + $0x8] sm:$0xff] }
 0x232   : > { %1785 = vmatpush.bf16.msra.mxu2 %v3114_v4  ;;  %1597 = vperm.xlu0 %2664, %v1543_v25  }
 0x233   : > { %1602 = vperm.xlu1 %2665, %v1544_v24  }
 0x235   : > { %1786 = vmatmul.bf16.vlgmr.msra.gmra.mxu2 %v2428_v60 }
 0x23a   : > { %1612 = vperm.xlu0 %2664, %v1546_v27  }
 0x23b   : > { %1617 = vperm.xlu1 %2665, %v1547_v26  }
 0x240   : > { %1288 = vmatmul.bf16.gmra.mxu0 %v2397_v29  ;;  %1318 = vmatmul.bf16.gmra.mxu3 %v2403_v30  ;;  %v2419_v29 = vld [vmem:[%s3278_s0 + $0x38] sm:$0xff]  ;;  %v2432_v30 = vld [vmem:[#allocation3 + $0x28] sm:$0xff] }
 0x245   : > { %1791 = vmatmul.bf16.gmra.mxu2 %v2429_v8 }
 0x250   : > { %1293 = vmatmul.bf16.gmra.mxu0 %v2398_v31  ;;  %v1538_v31 = vld [vmem:[%s3279_s1 + $0x20] sm:$0xff] }
 0x251   : > { %1572 = vperm.xlu2 %2666, %v1538_v31  }
 0x255   : > { %1796 = vmatmul.bf16.gmra.mxu2 %v2430_v16 }
 0x260   : > { %1298 = vmatmul.bf16.gmra.mxu0 %v2399_v32  ;;  %v1549_v32 = vld [vmem:[%s3279_s1 + $0x78] sm:$0xff] }
 0x261   : > { %1627 = vperm.xlu0 %2664, %v1549_v32  }
 0x265   : > { %1801 = vmatmul.bf16.gmra.mxu2 %v2431_v23 }
 0x270   : > { %1303 = vmatmul.bf16.gmra.mxu0 %v2400_v33  ;;  %v1539_v33 = vld [vmem:[%s3279_s1 + $0x28] sm:$0xff] }
 0x271   : > { %1577 = vperm.xlu2 %2666, %v1539_v33  }
 0x275   : > { %1806 = vmatmul.bf16.gmra.mxu2 %v2432_v30 }
 0x280   : > { %1308 = vmatmul.bf16.gmra.mxu0 %v2401_v34  ;;  %v2414_v34 = vld [vmem:[%s3278_s0 + $0x10] sm:$0xff] }
 0x2ad   : > { %v1284_v36 = vpop.f32.mrf.mxu0 }
 0x2b3   : > { %v1314_v37 = vpop.f32.mrf.mxu3 }
 0x2b5   : > { %v1286_v38 = vpop.f32.mrf.mxu0 }
 0x2b6   : > { %v2527_v39 = vpack.c.bf16 %v1286_v38, %v1284_v36  ;;  %v2434_v36 = vld [vmem:[#allocation3 + $0x30] sm:$0xff]  ;;  %v1542_v38 = vld [vmem:[%s3279_s1 + $0x40] sm:$0xff] }
 0x2b7   : > { %1592 = vperm.xlu2 %2666, %v1542_v38  }
 0x2b8   : > { %2528 = vst [vmem:[#allocation2 + $0x30] sm:$0xff] %v2527_v39   ;;  %v1545_v39 = vld [vmem:[%s3279_s1 + $0x58] sm:$0xff] }
 0x2bb   : > { %v1316_v40 = vpop.f32.mrf.mxu3 }
 0x2bc   : > { %v2557_v41 = vpack.c.bf16 %v1316_v40, %v1314_v37  ;;  %v2433_v37 = vld [vmem:[#allocation3 + $0x8] sm:$0xff]  ;;  %v2415_v40 = vld [vmem:[%s3278_s0 + $0x18] sm:$0xff] }
 0x2bd   : > { %v1289_v42 = vpop.f32.mrf.mxu0  ;;  %1811 = vmatmul.bf16.gmra.mxu2 %v2433_v37 }
 0x2be   : > { %2583 = vst [vmem:[#allocation2 + $0x28] sm:$0xff] %v2557_v41   ;;  %v2435_v41 = vld [vmem:[#allocation3 + $0x38] sm:$0xff] }
 0x2bf   : > { %v2420_v18 = vld [vmem:[#allocation2 + $0x30] sm:$0xff]  ;;  %1607 = vperm.xlu2 %2666, %v1545_v39  }
 0x2c3   : > { %v1319_v43 = vpop.f32.mrf.mxu3 }
 0x2c5   : > { %v1291_v44 = vpop.f32.mrf.mxu0  ;;  %v2426_v54 = vld [vmem:[#allocation2 + $0x28] sm:$0xff] }
 0x2c6   : > { %v2532_v45 = vpack.c.bf16 %v1291_v44, %v1289_v42  ;;  %v1548_v42 = vld [vmem:[%s3279_s1 + $0x70] sm:$0xff]  ;;  %v2417_v44 = vld [vmem:[%s3278_s0 + $0x28] sm:$0xff] }
 0x2c7   : > { %1622 = vperm.xlu2 %2666, %v1548_v42  }
 0x2c8   : > { %2578 = vst [vmem:[#allocation2] sm:$0xff] %v2532_v45   ;;  %v1787_v45 = vpop.f32.mrf.mxu2 }
 0x2cb   : > { %v1321_v46 = vpop.f32.mrf.mxu3 }
 0x2cc   : > { %v2562_v47 = vpack.c.bf16 %v1321_v46, %v1319_v43  ;;  %v2416_v43 = vld [vmem:[%s3278_s0 + $0x20] sm:$0xff] }
 0x2cd   : > { %v1294_v48 = vpop.f32.mrf.mxu0 }
 0x2ce   : > { %2584 = vst [vmem:[#allocation2 + $0x38] sm:$0xff] %v2562_v47   ;;  %v1553_v47 = vpop.permute.xlu0 %1552 }
 0x2cf   : > { %v2421_v2 = vld [vmem:[#allocation2] sm:$0xff] }
 0x2d0   : > { %v1789_v46 = vpop.f32.mrf.mxu2 }
 0x2d5   : > { %v1296_v50 = vpop.f32.mrf.mxu0  ;;  %v2427_v49 = vld [vmem:[#allocation2 + $0x38] sm:$0xff] }
 0x2d6   : > { %v2537_v51 = vpack.c.bf16 %v1296_v50, %v1294_v48  ;;  %1484 = vmatpush.bf16.msra.mxu1 %v2427_v49  ;;  %2617 = vmatpush.bf16.msrb.mxu3 %v2427_v49 }
 0x2d8   : > { %2579 = vst [vmem:[#allocation2 + $0x18] sm:$0xff] %v2537_v51   ;;  %v1792_v48 = vpop.f32.mrf.mxu2  ;;  %v3200_v51 = vld [vmem:[%s3286_s8] ss:$0 sm:$0xff] }
 0x2da   : > { %1485 = vmatpush.bf16.msra.mxu1 %v2426_v54  ;;  %2618 = vmatpush.bf16.msrb.mxu3 %v2426_v54  ;;  %v1563_v54 = vpop.permute.xlu1 %1562 }
 0x2dd   : > { %v1299_v56 = vpop.f32.mrf.mxu0 }
 0x2df   : > { %v2422_v19 = vld [vmem:[#allocation2 + $0x18] sm:$0xff] }
 0x2e5   : > { %v1301_v57 = vpop.f32.mrf.mxu0 }
 0x2e6   : > { %v2542_v58 = vpack.c.bf16 %v1301_v57, %v1299_v56 }
 0x2e8   : > { %2580 = vst [vmem:[#allocation2 + $0x10] sm:$0xff] %v2542_v58  }
 0x2ed   : > { %v1304_v62 = vpop.f32.mrf.mxu0 }
 0x2ef   : > { %v2423_v14 = vld [vmem:[#allocation2 + $0x10] sm:$0xff] }
 0x2f5   : > { %v1306_v1 = vpop.f32.mrf.mxu0 }
 0x2f6   : > { %v2547_v3 = vpack.c.bf16 %v1306_v1, %v1304_v62 }
 0x2f8   : > { %2581 = vst [vmem:[#allocation2 + $0x8] sm:$0xff] %v2547_v3  }
 0x2fd   : > { %v1309_v5 = vpop.f32.mrf.mxu0 }
 0x2ff   : > { %v2424_v13 = vld [vmem:[#allocation2 + $0x8] sm:$0xff] }
 0x305   : > { %v1311_v6 = vpop.f32.mrf.mxu0 }
 0x306   : > { %v2552_v7 = vpack.c.bf16 %v1311_v6, %v1309_v5 }
 0x308   : > { %2582 = vst [vmem:[#allocation2 + $0x20] sm:$0xff] %v2552_v7  }
 0x30f   : > { %v2425_v11 = vld [vmem:[#allocation2 + $0x20] sm:$0xff] }
 0x310   : > { %1486 = vmatpush.bf16.msra.mxu1 %v2425_v11  ;;  %2619 = vmatpush.bf16.msrb.mxu3 %v2425_v11 }
 0x314   : > { %1487 = vmatpush.bf16.msra.mxu1 %v2424_v13  ;;  %2620 = vmatpush.bf16.msrb.mxu3 %v2424_v13 }
 0x318   : > { %1488 = vmatpush.bf16.msra.mxu1 %v2423_v14  ;;  %2621 = vmatpush.bf16.msrb.mxu3 %v2423_v14 }
 0x31c   : > { %1489 = vmatpush.bf16.msra.mxu1 %v2422_v19  ;;  %2622 = vmatpush.bf16.msrb.mxu3 %v2422_v19 }
 0x320   : > { %1490 = vmatpush.bf16.msra.mxu1 %v2421_v2  ;;  %2623 = vmatpush.bf16.msrb.mxu3 %v2421_v2 }
 0x324   : > { %1491 = vmatpush.bf16.msra.mxu1 %v2420_v18  ;;  %2624 = vmatpush.bf16.msrb.mxu3 %v2420_v18 }
 0x327   : > { %1492 = vmatmul.bf16.vlgmr.msra.gmra.mxu1 %v2412_v35  ;;  %1522 = vmatmul.bf16.vlgmr.msrb.gmra.mxu3 %v2418_v22 }
 0x328   : > { %2625 = vmatpush.bf16.msra.mxu3 %v3072_v55 }
 0x32c   : > { %2626 = vmatpush.bf16.msra.mxu3 %v3078_v53 }
 0x330   : > { %2627 = vmatpush.bf16.msra.mxu3 %v3084_v52  ;;  %v1558_v52 = vpop.permute.xlu0 %1557 }
 0x334   : > { %2628 = vmatpush.bf16.msra.mxu3 %v3090_v59  ;;  %v1794_v59 = vpop.f32.mrf.mxu2 }
 0x337   : > { %1497 = vmatmul.bf16.gmra.mxu1 %v2413_v28  ;;  %1527 = vmatmul.bf16.gmra.mxu3 %v2419_v29 }
 0x338   : > { %2629 = vmatpush.bf16.msra.mxu3 %v3096_v61  ;;  %v1573_v61 = vpop.permute.xlu2 %1572  ;;  %v1583_v3 = vpop.permute.xlu0 %1582 }
 0x33c   : > { %2630 = vmatpush.bf16.msra.mxu3 %v3102_v63  ;;  %v1568_v63 = vpop.permute.xlu1 %1567  ;;  %v1797_v6 = vpop.f32.mrf.mxu2 }
 0x340   : > { %2631 = vmatpush.bf16.msra.mxu3 %v3108_v0  ;;  %v1578_v7 = vpop.permute.xlu2 %1577  ;;  %v3214_v12 = vpop.permute.xlu0 %1597 }
 0x344   : > { %2632 = vmatpush.bf16.msra.mxu3 %v3114_v4  ;;  %v1588_v9 = vpop.permute.xlu1 %1587  ;;  %v1799_v16 = vpop.f32.mrf.mxu2 }
 0x347   : > { %1502 = vmatmul.bf16.gmra.mxu1 %v2414_v34  ;;  %1816 = vmatmul.bf16.vlgmr.msra.gmra.mxu3 %v2434_v36 }
 0x348   : > { %v1593_v19 = vpop.permute.xlu2 %1592  ;;  %v1613_v18 = vpop.permute.xlu0 %1612 }
 0x34c   : > { %v1603_v2 = vpop.permute.xlu1 %1602  ;;  %v1802_v26 = vpop.f32.mrf.mxu2 }
 0x350   : > { %v1608_v28 = vpop.permute.xlu2 %1607 }
 0x354   : > { %v1618_v31 = vpop.permute.xlu1 %1617 }
 0x357   : > { %1507 = vmatmul.bf16.gmra.mxu1 %v2415_v40  ;;  %1821 = vmatmul.bf16.gmra.mxu3 %v2435_v41  ;;  %v1804_v41 = vpop.f32.mrf.mxu2 }
 0x358   : > { %v1623_v42 = vpop.permute.xlu2 %1622 }
 0x367   : > { %1512 = vmatmul.bf16.gmra.mxu1 %v2416_v43 }
 0x377   : > { %1517 = vmatmul.bf16.gmra.mxu1 %v2417_v44 }
 0x3a4   : > { %v1493_v50 = vpop.f32.mrf.mxu1 }
 0x3a5   : > { %v1630_v49 = vmul.f32 %v1553_v47, %v1493_v50 }
 0x3a7   : > { %v1827_v55 = vadd.f32 %v1787_v45, %v1630_v49 }
 0x3a9   : > { %v1847_v56 = vadd.f32 %v3200_v51, %v1827_v55 }
 0x3aa   : > { %v1523_v53 = vpop.f32.mrf.mxu3 }
 0x3ab   : > { %1863 = vst [vmem:[%s3287_s9] sm:$0xff] %v1847_v56  ;;  %v1642_v23 = vmul.f32 %v1613_v18, %v1523_v53  ;;  %v1807_v56 = vpop.f32.mrf.mxu2 }
 0x3ac   : > { %v1495_v57 = vpop.f32.mrf.mxu1 }
 0x3ad   : > { %v1631_v58 = vmul.f32 %v1558_v52, %v1495_v57 }
 0x3af   : > { %v1828_v62 = vadd.f32 %v1789_v46, %v1631_v58 }
 0x3b1   : > { %v1848_v0 = vadd.f32 %v3200_v51, %v1828_v62 }
 0x3b2   : > { %v1525_v1 = vpop.f32.mrf.mxu3 }
 0x3b3   : > { %1864 = vst [vmem:[%s3287_s9 + $0x8] sm:$0xff] %v1848_v0  ;;  %v1643_v33 = vmul.f32 %v1618_v31, %v1525_v1  ;;  %v1809_v1 = vpop.f32.mrf.mxu2 }
 0x3b4   : > { %v1498_v4 = vpop.f32.mrf.mxu1 }
 0x3b5   : > { %v1632_v60 = vmul.f32 %v1563_v54, %v1498_v4  ;;  %v1628_v54 = vpop.permute.xlu0 %1627 }
 0x3b7   : > { %v1829_v5 = vadd.f32 %v1792_v48, %v1632_v60 }
 0x3b9   : > { %v1849_v8 = vadd.f32 %v3200_v51, %v1829_v5 }
 0x3ba   : > { %v1528_v10 = vpop.f32.mrf.mxu3 }
 0x3bb   : > { %1865 = vst [vmem:[%s3287_s9 + $0x10] sm:$0xff] %v1849_v8  ;;  %v1644_v45 = vmul.f32 %v1623_v42, %v1528_v10 }
 0x3bc   : > { %v1500_v11 = vpop.f32.mrf.mxu1 }
 0x3bd   : > { %v1633_v13 = vmul.f32 %v1568_v63, %v1500_v11 }
 0x3bf   : > { %v1830_v14 = vadd.f32 %v1794_v59, %v1633_v13 }
 0x3c1   : > { %v1850_v15 = vadd.f32 %v3200_v51, %v1830_v14 }
 0x3c2   : > { %v1530_v17 = vpop.f32.mrf.mxu3 }
 0x3c3   : > { %1866 = vst [vmem:[%s3287_s9 + $0x18] sm:$0xff] %v1850_v15  ;;  %v1645_v53 = vmul.f32 %v1628_v54, %v1530_v17 }
 0x3c4   : > { %v1503_v20 = vpop.f32.mrf.mxu1 }
 0x3c5   : > { %v1634_v21 = vmul.f32 %v1573_v61, %v1503_v20 }
 0x3c7   : > { %v1831_v35 = vadd.f32 %v1797_v6, %v1634_v21  ;;  %v1812_v6 = vpop.f32.mrf.mxu2 }
 0x3c9   : > { %v1851_v22 = vadd.f32 %v3200_v51, %v1831_v35 }
 0x3ca   : > { %v1817_v24 = vpop.f32.mrf.mxu3 }
 0x3cb   : > { %1867 = vst [vmem:[%s3287_s9 + $0x20] sm:$0xff] %v1851_v22  ;;  %v1839_v25 = vadd.f32 %v1817_v24, %v1642_v23 }
 0x3cc   : > { %v1505_v27 = vpop.f32.mrf.mxu1 }
 0x3cd   : > { %v1859_v29 = vadd.f32 %v3200_v51, %v1839_v25  ;;  %v1635_v30 = vmul.f32 %v1578_v7, %v1505_v27 }
 0x3cf   : > { %1875 = vst [vmem:[%s3287_s9 + $0x60] sm:$0xff] %v1859_v29  ;;  %v1832_v32 = vadd.f32 %v1799_v16, %v1635_v30 }
 0x3d1   : > { %v1852_v34 = vadd.f32 %v3200_v51, %v1832_v32 }
 0x3d2   : > { %v1819_v36 = vpop.f32.mrf.mxu3 }
 0x3d3   : > { %1868 = vst [vmem:[%s3287_s9 + $0x28] sm:$0xff] %v1852_v34  ;;  %v1840_v37 = vadd.f32 %v1819_v36, %v1643_v33 }
 0x3d4   : > { %v1508_v38 = vpop.f32.mrf.mxu1 }
 0x3d5   : > { %v1860_v39 = vadd.f32 %v3200_v51, %v1840_v37  ;;  %v1636_v40 = vmul.f32 %v1583_v3, %v1508_v38 }
 0x3d7   : > { %1876 = vst [vmem:[%s3287_s9 + $0x68] sm:$0xff] %v1860_v39  ;;  %v1833_v43 = vadd.f32 %v1802_v26, %v1636_v40 }
 0x3d9   : > { %v1853_v44 = vadd.f32 %v3200_v51, %v1833_v43 }
 0x3da   : > { %v1822_v46 = vpop.f32.mrf.mxu3 }
 0x3db   : > { %1869 = vst [vmem:[%s3287_s9 + $0x30] sm:$0xff] %v1853_v44  ;;  %v1841_v47 = vadd.f32 %v1822_v46, %v1644_v45 }
 0x3dc   : > { %v1510_v48 = vpop.f32.mrf.mxu1 }
 0x3dd   : > { %v1861_v50 = vadd.f32 %v3200_v51, %v1841_v47  ;;  %v1637_v49 = vmul.f32 %v1588_v9, %v1510_v48 }
 0x3df   : > { %1877 = vst [vmem:[%s3287_s9 + $0x70] sm:$0xff] %v1861_v50  ;;  %v1834_v55 = vadd.f32 %v1804_v41, %v1637_v49 }
 0x3e1   : > { %v1854_v52 = vadd.f32 %v3200_v51, %v1834_v55 }
 0x3e2   : > { %v1824_v57 = vpop.f32.mrf.mxu3 }
 0x3e3   : > { %1870 = vst [vmem:[%s3287_s9 + $0x38] sm:$0xff] %v1854_v52  ;;  %v1842_v58 = vadd.f32 %v1824_v57, %v1645_v53 }
 0x3e4   : > { %v1513_v59 = vpop.f32.mrf.mxu1 }
 0x3e5   : > { %v1862_v61 = vadd.f32 %v3200_v51, %v1842_v58  ;;  %v1638_v62 = vmul.f32 %v1593_v19, %v1513_v59 }
 0x3e7   : > { %1878 = vst [vmem:[%s3287_s9 + $0x78] sm:$0xff] %v1862_v61  ;;  %v1835_v63 = vadd.f32 %v1807_v56, %v1638_v62 }
 0x3e9   : > { %v1855_v0 = vadd.f32 %v3200_v51, %v1835_v63 }
 0x3eb   : > { %1871 = vst [vmem:[%s3287_s9 + $0x40] sm:$0xff] %v1855_v0 }
 0x3ec   : > { %v1515_v3 = vpop.f32.mrf.mxu1 }
 0x3ed   : > { %v1639_v4 = vmul.f32 %v3214_v12, %v1515_v3  ;;  %v1814_v12 = vpop.f32.mrf.mxu2 }
 0x3ef   : > { %v1836_v60 = vadd.f32 %v1809_v1, %v1639_v4 }
 0x3f1   : > { %v1856_v5 = vadd.f32 %v3200_v51, %v1836_v60 }
 0x3f3   : > { %1872 = vst [vmem:[%s3287_s9 + $0x48] sm:$0xff] %v1856_v5 }
 0x3f4   : > { %v1518_v7 = vpop.f32.mrf.mxu1 }
 0x3f5   : > { %v1640_v8 = vmul.f32 %v1603_v2, %v1518_v7 }
 0x3f7   : > { %v1837_v9 = vadd.f32 %v1812_v6, %v1640_v8 }
 0x3f9   : > { %v1857_v10 = vadd.f32 %v3200_v51, %v1837_v9 }
 0x3fb   : > { %1873 = vst [vmem:[%s3287_s9 + $0x50] sm:$0xff] %v1857_v10 }
 0x3fc   : > { %v1520_v11 = vpop.f32.mrf.mxu1 }
 0x3fd   : > { %v1641_v13 = vmul.f32 %v1608_v28, %v1520_v11 }
 0x3ff   : > { %v1838_v14 = vadd.f32 %v1814_v12, %v1641_v13 }
 0x401   : > { %v1858_v15 = vadd.f32 %v3200_v51, %v1838_v14 }
 0x403   : > { %1874 = vst [vmem:[%s3287_s9 + $0x58] sm:$0xff] %v1858_v15 }
 0x404 PF: > { %s19_s11 = sadd.s32 1, %s2690_s11   ;;  %s3288_s30 = smov %s2686_s10 }
 0x405   : > { %p16_p6 = scmp.ge.s32.totalorder %s19_s11, 4   ;;  %s3289_s10 = smov %s3291_s12 }
 0x407   :  { %18 = sbr.rel (!%p16_p6) target bundleno = 2 (0x2), region = 107 }

</bundles_post_ra>
